<compile_context>
chip_gen: v6e
topology: v6e:2x2x1
jax: 0.10.0
libtpu: 0.0.40
codegen_flags: <defaults>
</compile_context>

<pallas_src>
import functools

import jax
import jax.numpy as jnp
from jax.experimental import pallas as pl
from jax.experimental.pallas import tpu as pltpu


def _choose_tile_rows(H, W, target_rows=448):
    """Pick TH image rows per grid step: TH | H and TH*W % 8 == 0 if possible."""
    divisors = [d for d in range(1, H + 1) if H % d == 0]
    aligned = [d for d in divisors if (d * W) % 8 == 0]
    if not aligned:
        return H                       # single tile per image (block == full dim)
    for d in aligned:
        if d * W >= target_rows:
            return d
    return aligned[-1]


def _mixd_ffn_kernel(x_ref, w1_ref, b1_ref, cw_ref, cb_ref, w2_ref, b2_ref,
                     o_ref, hpad_ref, *, W, RB, PAD_TOP):
    # x_ref:   (N + 2W, C1)  bf16  zero-padded tokens of one image (one row halo/side)
    # w1_ref:  (C1, C2)      bf16  fc1 weight (VMEM-resident across the grid)
    # b1_ref:  (1, C2)       f32   fc1 bias
    # cw_ref:  (9, C2)       f32   depthwise 3x3 weights, tap-major (ky*3+kx, channel)
    # cb_ref:  (1, C2)       f32   depthwise conv bias
    # w2_ref:  (C2, C1)      bf16  fc2 weight (VMEM-resident)
    # b2_ref:  (1, C1)       f32   fc2 bias
    # o_ref:   (RB, C1)      output tokens of this row block
    # hpad_ref:(PAD_TOP + RB + 2W + 8, C2) bf16 scratch (conv input + halos)
    s = pl.program_id(1)
    n_s = pl.num_programs(1)
    C2 = w1_ref.shape[1]
    halo = W
    rows = RB + 2 * halo

    # ---- phase 1: fc1 on this row block + one-image-row halo -> bf16 scratch ----
    start = pl.multiple_of(s * RB, 8)
    xs = x_ref[pl.ds(start, rows), :]                               # (rows, C1) bf16
    h = jnp.dot(xs, w1_ref[...], preferred_element_type=jnp.float32)
    h = h + b1_ref[...]                                             # (rows, C2) f32
    hpad_ref[pl.ds(PAD_TOP, rows), :] = h.astype(hpad_ref.dtype)

    # Conv zero padding at the image top/bottom (padding is applied AFTER fc1+bias,
    # so the halo rows at the image boundary must be exactly zero, not fc1(0)=b1).
    zhalo = jnp.zeros((halo, C2), hpad_ref.dtype)

    @pl.when(s == 0)
    def _():
        hpad_ref[pl.ds(PAD_TOP, halo), :] = zhalo

    @pl.when(s == n_s - 1)
    def _():
        hpad_ref[pl.ds(PAD_TOP + halo + RB, halo), :] = zhalo

    # Guard rows (touched only by column-masked taps at the tile ends); zero anyway.
    zrow = jnp.zeros((1, C2), hpad_ref.dtype)
    hpad_ref[pl.ds(PAD_TOP - 1, 1), :] = zrow
    hpad_ref[pl.ds(PAD_TOP + rows, 1), :] = zrow

    # ---- phase 2: depthwise 3x3 (cross-correlation, zero pad) + fc2 -------------
    cw = cw_ref[...]                                                # (9, C2) f32
    col = jax.lax.broadcasted_iota(jnp.int32, (RB, 1), 0) % W       # x-coordinate
    left_ok = col > 0                                               # column c-1 exists
    right_ok = col < (W - 1)                                        # column c+1 exists

    def strip(dy, dx):
        off = PAD_TOP + W * (1 + dy) + dx                           # static offset
        return hpad_ref[pl.ds(off, RB), :].astype(jnp.float32)      # (RB, C2)

    # tap index k = (dy+1)*3 + (dx+1); group by dx so only 2 masks are needed.
    center = (strip(-1, 0) * cw[1:2, :] + strip(0, 0) * cw[4:5, :]
              + strip(1, 0) * cw[7:8, :])
    left = (strip(-1, -1) * cw[0:1, :] + strip(0, -1) * cw[3:4, :]
            + strip(1, -1) * cw[6:7, :])
    right = (strip(-1, 1) * cw[2:3, :] + strip(0, 1) * cw[5:6, :]
             + strip(1, 1) * cw[8:9, :])
    ax = center + jnp.where(left_ok, left, 0.0) + jnp.where(right_ok, right, 0.0)
    ax = ax + cb_ref[...]                                           # (RB, C2) f32

    # NOTE: the original forward also builds `fuse = gelu(ax + fc1(x))`, which is
    # dead code w.r.t. the returned value (out = fc2(ax)), so it is skipped.

    out = jnp.dot(ax.astype(jnp.bfloat16), w2_ref[...],
                  preferred_element_type=jnp.float32)
    out = out + b2_ref[...]                                         # (RB, C1) f32
    o_ref[...] = out.astype(o_ref.dtype)


def mixd_ffn_forward(x, fc1_w, fc1_b, dw_w, dw_b, fc2_w, fc2_b, H, W,
                     target_rows=448):
    """MixD_FFN forward (fuse_mode='add' output path): fc2(dwconv(fc1(x))).

    x:     (B, N=H*W, C1)
    fc1_w: (C1, C2), fc1_b: (C2,)
    dw_w:  (3, 3, C2)  -- torch Conv2d weight (C2,1,3,3) as weight[:,0].permute(1,2,0)
    dw_b:  (C2,)
    fc2_w: (C2, C1), fc2_b: (C1,)
    returns (B, N, C1) in x.dtype
    """
    B, N, C1 = x.shape
    assert N == H * W, "input feature has wrong size"
    C2 = fc1_w.shape[1]
    assert fc1_w.shape == (C1, C2)
    assert fc2_w.shape == (C2, C1)
    assert dw_w.shape == (3, 3, C2)

    TH = _choose_tile_rows(H, W, target_rows)
    RB = TH * W                       # tokens per grid step
    S = H // TH                       # row blocks per image
    PAD_TOP = 8
    rows = RB + 2 * W
    Npad = N + 2 * W
    SCR_ROWS = PAD_TOP + rows + 8

    # bf16 MXU operands; one image row of zero padding on each side of the token axis.
    x_pad = jnp.pad(x.astype(jnp.bfloat16), ((0, 0), (W, W), (0, 0)))
    w1b = fc1_w.astype(jnp.bfloat16)
    w2b = fc2_w.astype(jnp.bfloat16)
    cw9 = dw_w.reshape(9, C2).astype(jnp.float32)   # pure reshape, tap-major
    b1r = fc1_b.reshape(1, C2).astype(jnp.float32)
    cbr = dw_b.reshape(1, C2).astype(jnp.float32)
    b2r = fc2_b.reshape(1, C1).astype(jnp.float32)

    out_dtype = x.dtype
    odt = jnp.dtype(out_dtype).itemsize
    bf, f4 = 2, 4
    need = (SCR_ROWS * C2 * bf                   # bf16 conv-input scratch
            + 2 * Npad * C1 * bf                 # x block (double-buffered)
            + 2 * RB * C1 * odt                  # out block (double-buffered)
            + 2 * (C1 * C2 + C2 * C1) * bf       # fc1/fc2 weights
            + 2 * (11 * C2 + C1) * f4            # biases + conv weights
            + 3 * rows * C2 * f4)                # live f32 tile temporaries
    vmem_limit = min(max(int(need * 1.25) + (2 << 20), 8 << 20), 64 << 20)

    kernel = functools.partial(_mixd_ffn_kernel, W=W, RB=RB, PAD_TOP=PAD_TOP)
    return pl.pallas_call(
        kernel,
        out_shape=jax.ShapeDtypeStruct((B, N, C1), out_dtype),
        grid_spec=pltpu.PrefetchScalarGridSpec(
            num_scalar_prefetch=0,
            grid=(B, S),
            in_specs=[
                pl.BlockSpec((None, Npad, C1), lambda b, s: (b, 0, 0)),  # x (padded, per image)
                pl.BlockSpec((C1, C2), lambda b, s: (0, 0)),             # fc1 weight (resident)
                pl.BlockSpec((1, C2), lambda b, s: (0, 0)),              # fc1 bias
                pl.BlockSpec((9, C2), lambda b, s: (0, 0)),              # dwconv weight
                pl.BlockSpec((1, C2), lambda b, s: (0, 0)),              # dwconv bias
                pl.BlockSpec((C2, C1), lambda b, s: (0, 0)),             # fc2 weight (resident)
                pl.BlockSpec((1, C1), lambda b, s: (0, 0)),              # fc2 bias
            ],
            out_specs=pl.BlockSpec((None, RB, C1), lambda b, s: (b, s, 0)),
            scratch_shapes=[pltpu.VMEM((SCR_ROWS, C2), jnp.bfloat16)],
        ),
        compiler_params=pltpu.CompilerParams(
            dimension_semantics=("parallel", "parallel"),
            vmem_limit_bytes=vmem_limit),
    )(x_pad, w1b, b1r, cw9, cbr, w2b, b2r)


def _reference(x, fc1_w, fc1_b, dw_w, dw_b, fc2_w, fc2_b, H, W):
    """Pure-JAX f32 reference mirroring the PyTorch forward (output path only)."""
    B, N, C1 = x.shape
    C2 = fc1_w.shape[1]
    h = jnp.einsum("bnc,cd->bnd", x, fc1_w,
                   precision=jax.lax.Precision.HIGHEST) + fc1_b      # (B, N, C2)
    img = h.reshape(B, H, W, C2)
    imgp = jnp.pad(img, ((0, 0), (1, 1), (1, 1), (0, 0)))
    acc = jnp.zeros_like(img)
    for ky in range(3):
        for kx in range(3):
            acc = acc + imgp[:, ky:ky + H, kx:kx + W, :] * dw_w[ky, kx]
    ax = (acc + dw_b).reshape(B, N, C2)
    return jnp.einsum("bnd,dc->bnc", ax, fc2_w,
                      precision=jax.lax.Precision.HIGHEST) + fc2_b   # (B, N, C1)


if __name__ == "__main__":
    # Small shapes consistent with the module: B=2, H=W=8 -> N=64, c1=64, c2=128.
    B, H, W = 2, 8, 8
    C1, C2 = 64, 128
    N = H * W

    key = jax.random.PRNGKey(0)
    ks = jax.random.split(key, 7)
    x = jax.random.normal(ks[0], (B, N, C1), dtype=jnp.float32)
    fc1_w = 0.05 * jax.random.normal(ks[1], (C1, C2), dtype=jnp.float32)
    fc1_b = 0.05 * jax.random.normal(ks[2], (C2,), dtype=jnp.float32)
    # torch depthwise weight is (C2, 1, 3, 3); synthetic init stored as (3, 3, C2).
    dw_w = 0.2 * jax.random.normal(ks[3], (3, 3, C2), dtype=jnp.float32)
    dw_b = 0.05 * jax.random.normal(ks[4], (C2,), dtype=jnp.float32)
    fc2_w = 0.05 * jax.random.normal(ks[5], (C2, C1), dtype=jnp.float32)
    fc2_b = 0.05 * jax.random.normal(ks[6], (C1,), dtype=jnp.float32)

    # target_rows=32 forces S=2 row blocks per image at this toy size, so the
    # inter-tile halo / boundary-zeroing paths are exercised by the check.
    out = mixd_ffn_forward(x, fc1_w, fc1_b, dw_w, dw_b, fc2_w, fc2_b, H, W,
                           target_rows=32)
    out = jax.block_until_ready(out)

    ref = _reference(x, fc1_w, fc1_b, dw_w, dw_b, fc2_w, fc2_b, H, W)
    assert out.shape == (B, N, C1), out.shape
    max_err = float(jnp.max(jnp.abs(out - ref)))
    # bf16 MXU operands + bf16 conv-input staging vs. an all-f32 HIGHEST reference.
    assert jnp.allclose(out, ref, atol=2e-2, rtol=2e-2), max_err
    print("KERNEL_OK")
</pallas_src>

<mosaic_0001>
module attributes {stable_mosaic.version = 11 : i64} {
  func.func @_mixd_ffn_kernel(%arg0: i32, %arg1: i32, %arg2: memref<1x80x64xbf16, #tpu.memory_space<vmem>>, %arg3: memref<64x128xbf16, #tpu.memory_space<vmem>>, %arg4: memref<1x128xf32, #tpu.memory_space<vmem>>, %arg5: memref<9x128xf32, #tpu.memory_space<vmem>>, %arg6: memref<1x128xf32, #tpu.memory_space<vmem>>, %arg7: memref<128x64xbf16, #tpu.memory_space<vmem>>, %arg8: memref<1x64xf32, #tpu.memory_space<vmem>>, %arg9: memref<1x32x64xf32, #tpu.memory_space<vmem>>, %arg10: memref<64x128xbf16, #tpu.memory_space<vmem>>) attributes {dimension_semantics = [#tpu.dimension_semantics<parallel>, #tpu.dimension_semantics<parallel>], iteration_bounds = array<i64: 2, 2>, scalar_prefetch = 0 : i64, scratch_operands = 1 : i64, tpu.core_type = #tpu.core_type<tc>, window_params = [{transform_indices = @transform_0, window_bounds = array<i64: 1, 80, 64>}, {pipeline_mode = #tpu.pipeline_mode<synchronous>, transform_indices = @transform_1, window_bounds = array<i64: 64, 128>}, {pipeline_mode = #tpu.pipeline_mode<synchronous>, transform_indices = @transform_2, window_bounds = array<i64: 1, 128>}, {pipeline_mode = #tpu.pipeline_mode<synchronous>, transform_indices = @transform_3, window_bounds = array<i64: 9, 128>}, {pipeline_mode = #tpu.pipeline_mode<synchronous>, transform_indices = @transform_4, window_bounds = array<i64: 1, 128>}, {pipeline_mode = #tpu.pipeline_mode<synchronous>, transform_indices = @transform_5, window_bounds = array<i64: 128, 64>}, {pipeline_mode = #tpu.pipeline_mode<synchronous>, transform_indices = @transform_6, window_bounds = array<i64: 1, 64>}, {transform_indices = @transform_7, window_bounds = array<i64: 1, 32, 64>}]} {
    %c32_i32 = arith.constant 32 : i32
    %0 = arith.muli %arg1, %c32_i32 : i32
    %1 = tpu.assume_multiple %0, 8 : i32
    %c0 = arith.constant 0 : index
    %2 = arith.index_cast %1 : i32 to index
    %c0_0 = arith.constant 0 : index
    %3 = vector.load %arg2[%c0, %2, %c0_0] : memref<1x80x64xbf16, #tpu.memory_space<vmem>>, vector<1x48x64xbf16>
    %4 = vector.shape_cast %3 : vector<1x48x64xbf16> to vector<48x64xbf16>
    %c0_1 = arith.constant 0 : index
    %c0_2 = arith.constant 0 : index
    %5 = vector.load %arg3[%c0_1, %c0_2] : memref<64x128xbf16, #tpu.memory_space<vmem>>, vector<64x128xbf16>
    %cst = arith.constant dense<0.000000e+00> : vector<48x128xf32>
    %6 = tpu.matmul %4, %5, %cst {dimension_numbers = #tpu.dot_dimension_numbers<[1], [0], [0], [1], [0, 0, 1, 1], [], []>} : vector<48x64xbf16>, vector<64x128xbf16>, vector<48x128xf32> -> vector<48x128xf32>
    %c0_3 = arith.constant 0 : index
    %c0_4 = arith.constant 0 : index
    %7 = vector.load %arg4[%c0_3, %c0_4] : memref<1x128xf32, #tpu.memory_space<vmem>>, vector<1x128xf32>
    %8 = vector.broadcast %7 : vector<1x128xf32> to vector<48x128xf32>
    %9 = arith.addf %6, %8 : vector<48x128xf32>
    %10 = arith.truncf %9 : vector<48x128xf32> to vector<48x128xbf16>
    %c8 = arith.constant 8 : index
    %c0_5 = arith.constant 0 : index
    %11 = vector.load %arg10[%c8, %c0_5] : memref<64x128xbf16, #tpu.memory_space<vmem>>, vector<48x128xbf16>
    tpu.vector_store %arg10[%c8, %c0_5], %10 {strides = array<i32>} : memref<64x128xbf16, #tpu.memory_space<vmem>>, vector<48x128xbf16>,
    %cst_6 = arith.constant 0.000000e+00 : bf16
    %12 = vector.broadcast %cst_6 : bf16 to vector<8x128xbf16>
    %c0_i32 = arith.constant 0 : i32
    %13 = arith.cmpi eq, %arg1, %c0_i32 : i32
    %14 = arith.extui %13 : i1 to i32
    %c0_i32_7 = arith.constant 0 : i32
    %15 = arith.cmpi ne, %14, %c0_i32_7 : i32
    scf.if %15 {
      %c8_43 = arith.constant 8 : index
      %c0_44 = arith.constant 0 : index
      %117 = vector.load %arg10[%c8_43, %c0_44] : memref<64x128xbf16, #tpu.memory_space<vmem>>, vector<8x128xbf16>
      tpu.vector_store %arg10[%c8_43, %c0_44], %12 {strides = array<i32>} : memref<64x128xbf16, #tpu.memory_space<vmem>>, vector<8x128xbf16>,
    } else {
    }
    %c1_i32 = arith.constant 1 : i32
    %16 = arith.cmpi eq, %arg1, %c1_i32 : i32
    %17 = arith.extui %16 : i1 to i32
    %c0_i32_8 = arith.constant 0 : i32
    %18 = arith.cmpi ne, %17, %c0_i32_8 : i32
    scf.if %18 {
      %c48 = arith.constant 48 : index
      %c0_43 = arith.constant 0 : index
      %117 = vector.load %arg10[%c48, %c0_43] : memref<64x128xbf16, #tpu.memory_space<vmem>>, vector<8x128xbf16>
      tpu.vector_store %arg10[%c48, %c0_43], %12 {strides = array<i32>} : memref<64x128xbf16, #tpu.memory_space<vmem>>, vector<8x128xbf16>,
    } else {
    }
    %cst_9 = arith.constant 0.000000e+00 : bf16
    %19 = vector.broadcast %cst_9 : bf16 to vector<1x128xbf16>
    %c7 = arith.constant 7 : index
    %c0_10 = arith.constant 0 : index
    %20 = vector.load %arg10[%c7, %c0_10] : memref<64x128xbf16, #tpu.memory_space<vmem>>, vector<1x128xbf16>
    tpu.vector_store %arg10[%c7, %c0_10], %19 {strides = array<i32>} : memref<64x128xbf16, #tpu.memory_space<vmem>>, vector<1x128xbf16>,
    %c56 = arith.constant 56 : index
    %c0_11 = arith.constant 0 : index
    %21 = vector.load %arg10[%c56, %c0_11] : memref<64x128xbf16, #tpu.memory_space<vmem>>, vector<1x128xbf16>
    tpu.vector_store %arg10[%c56, %c0_11], %19 {strides = array<i32>} : memref<64x128xbf16, #tpu.memory_space<vmem>>, vector<1x128xbf16>,
    %c0_12 = arith.constant 0 : index
    %c0_13 = arith.constant 0 : index
    %22 = vector.load %arg5[%c0_12, %c0_13] : memref<9x128xf32, #tpu.memory_space<vmem>>, vector<9x128xf32>
    %23 = tpu.iota {dimensions = array<i32: 0>} : vector<32x1xi32>
    %c8_i32 = arith.constant 8 : i32
    %c0_i32_14 = arith.constant 0 : i32
    %24 = arith.cmpi eq, %c8_i32, %c0_i32_14 : i32
    %c1_i32_15 = arith.constant 1 : i32
    %25 = arith.select %24, %c1_i32_15, %c8_i32 : i32
    %26 = vector.broadcast %25 : i32 to vector<32x1xi32>
    %27 = arith.remsi %23, %26 : vector<32x1xi32>
    %c0_i32_16 = arith.constant 0 : i32
    %28 = vector.broadcast %c0_i32_16 : i32 to vector<32x1xi32>
    %29 = arith.cmpi ne, %27, %28 : vector<32x1xi32>
    %c0_i32_17 = arith.constant 0 : i32
    %30 = vector.broadcast %c0_i32_17 : i32 to vector<32x1xi32>
    %31 = arith.cmpi slt, %27, %30 : vector<32x1xi32>
    %c0_i32_18 = arith.constant 0 : i32
    %32 = arith.cmpi slt, %25, %c0_i32_18 : i32
    %33 = vector.broadcast %32 : i1 to vector<32x1xi1>
    %34 = vector.broadcast %33 : vector<32x1xi1> to vector<32x1xi1>
    %35 = arith.xori %31, %34 : vector<32x1xi1>
    %36 = arith.andi %35, %29 : vector<32x1xi1>
    %37 = vector.broadcast %25 : i32 to vector<32x1xi32>
    %38 = arith.addi %27, %37 : vector<32x1xi32>
    %39 = arith.select %36, %38, %27 : vector<32x1xi1>, vector<32x1xi32>
    %c0_i32_19 = arith.constant 0 : i32
    %40 = vector.broadcast %c0_i32_19 : i32 to vector<32x1xi32>
    %41 = arith.cmpi sgt, %39, %40 : vector<32x1xi32>
    %c7_i32 = arith.constant 7 : i32
    %42 = vector.broadcast %c7_i32 : i32 to vector<32x1xi32>
    %43 = arith.cmpi slt, %39, %42 : vector<32x1xi32>
    %c8_20 = arith.constant 8 : index
    %c0_21 = arith.constant 0 : index
    %44 = vector.load %arg10[%c8_20, %c0_21] : memref<64x128xbf16, #tpu.memory_space<vmem>>, vector<32x128xbf16>
    %45 = arith.extf %44 : vector<32x128xbf16> to vector<32x128xf32>
    %46 = vector.extract_strided_slice %22 {offsets = [1, 0], sizes = [1, 128], strides = [1, 1]} : vector<9x128xf32> to vector<1x128xf32>
    %47 = vector.broadcast %46 : vector<1x128xf32> to vector<32x128xf32>
    %48 = arith.mulf %45, %47 : vector<32x128xf32>
    %c16 = arith.constant 16 : index
    %c0_22 = arith.constant 0 : index
    %49 = vector.load %arg10[%c16, %c0_22] : memref<64x128xbf16, #tpu.memory_space<vmem>>, vector<32x128xbf16>
    %50 = arith.extf %49 : vector<32x128xbf16> to vector<32x128xf32>
    %51 = vector.extract_strided_slice %22 {offsets = [4, 0], sizes = [1, 128], strides = [1, 1]} : vector<9x128xf32> to vector<1x128xf32>
    %52 = vector.broadcast %51 : vector<1x128xf32> to vector<32x128xf32>
    %53 = arith.mulf %50, %52 : vector<32x128xf32>
    %54 = arith.addf %48, %53 : vector<32x128xf32>
    %c24 = arith.constant 24 : index
    %c0_23 = arith.constant 0 : index
    %55 = vector.load %arg10[%c24, %c0_23] : memref<64x128xbf16, #tpu.memory_space<vmem>>, vector<32x128xbf16>
    %56 = arith.extf %55 : vector<32x128xbf16> to vector<32x128xf32>
    %57 = vector.extract_strided_slice %22 {offsets = [7, 0], sizes = [1, 128], strides = [1, 1]} : vector<9x128xf32> to vector<1x128xf32>
    %58 = vector.broadcast %57 : vector<1x128xf32> to vector<32x128xf32>
    %59 = arith.mulf %56, %58 : vector<32x128xf32>
    %60 = arith.addf %54, %59 : vector<32x128xf32>
    %c7_24 = arith.constant 7 : index
    %c0_25 = arith.constant 0 : index
    %61 = vector.load %arg10[%c7_24, %c0_25] : memref<64x128xbf16, #tpu.memory_space<vmem>>, vector<32x128xbf16>
    %62 = arith.extf %61 : vector<32x128xbf16> to vector<32x128xf32>
    %63 = vector.extract_strided_slice %22 {offsets = [0, 0], sizes = [1, 128], strides = [1, 1]} : vector<9x128xf32> to vector<1x128xf32>
    %64 = vector.broadcast %63 : vector<1x128xf32> to vector<32x128xf32>
    %65 = arith.mulf %62, %64 : vector<32x128xf32>
    %c15 = arith.constant 15 : index
    %c0_26 = arith.constant 0 : index
    %66 = vector.load %arg10[%c15, %c0_26] : memref<64x128xbf16, #tpu.memory_space<vmem>>, vector<32x128xbf16>
    %67 = arith.extf %66 : vector<32x128xbf16> to vector<32x128xf32>
    %68 = vector.extract_strided_slice %22 {offsets = [3, 0], sizes = [1, 128], strides = [1, 1]} : vector<9x128xf32> to vector<1x128xf32>
    %69 = vector.broadcast %68 : vector<1x128xf32> to vector<32x128xf32>
    %70 = arith.mulf %67, %69 : vector<32x128xf32>
    %71 = arith.addf %65, %70 : vector<32x128xf32>
    %c23 = arith.constant 23 : index
    %c0_27 = arith.constant 0 : index
    %72 = vector.load %arg10[%c23, %c0_27] : memref<64x128xbf16, #tpu.memory_space<vmem>>, vector<32x128xbf16>
    %73 = arith.extf %72 : vector<32x128xbf16> to vector<32x128xf32>
    %74 = vector.extract_strided_slice %22 {offsets = [6, 0], sizes = [1, 128], strides = [1, 1]} : vector<9x128xf32> to vector<1x128xf32>
    %75 = vector.broadcast %74 : vector<1x128xf32> to vector<32x128xf32>
    %76 = arith.mulf %73, %75 : vector<32x128xf32>
    %77 = arith.addf %71, %76 : vector<32x128xf32>
    %c9 = arith.constant 9 : index
    %c0_28 = arith.constant 0 : index
    %78 = vector.load %arg10[%c9, %c0_28] : memref<64x128xbf16, #tpu.memory_space<vmem>>, vector<32x128xbf16>
    %79 = arith.extf %78 : vector<32x128xbf16> to vector<32x128xf32>
    %80 = vector.extract_strided_slice %22 {offsets = [2, 0], sizes = [1, 128], strides = [1, 1]} : vector<9x128xf32> to vector<1x128xf32>
    %81 = vector.broadcast %80 : vector<1x128xf32> to vector<32x128xf32>
    %82 = arith.mulf %79, %81 : vector<32x128xf32>
    %c17 = arith.constant 17 : index
    %c0_29 = arith.constant 0 : index
    %83 = vector.load %arg10[%c17, %c0_29] : memref<64x128xbf16, #tpu.memory_space<vmem>>, vector<32x128xbf16>
    %84 = arith.extf %83 : vector<32x128xbf16> to vector<32x128xf32>
    %85 = vector.extract_strided_slice %22 {offsets = [5, 0], sizes = [1, 128], strides = [1, 1]} : vector<9x128xf32> to vector<1x128xf32>
    %86 = vector.broadcast %85 : vector<1x128xf32> to vector<32x128xf32>
    %87 = arith.mulf %84, %86 : vector<32x128xf32>
    %88 = arith.addf %82, %87 : vector<32x128xf32>
    %c25 = arith.constant 25 : index
    %c0_30 = arith.constant 0 : index
    %89 = vector.load %arg10[%c25, %c0_30] : memref<64x128xbf16, #tpu.memory_space<vmem>>, vector<32x128xbf16>
    %90 = arith.extf %89 : vector<32x128xbf16> to vector<32x128xf32>
    %91 = vector.extract_strided_slice %22 {offsets = [8, 0], sizes = [1, 128], strides = [1, 1]} : vector<9x128xf32> to vector<1x128xf32>
    %92 = vector.broadcast %91 : vector<1x128xf32> to vector<32x128xf32>
    %93 = arith.mulf %90, %92 : vector<32x128xf32>
    %94 = arith.addf %88, %93 : vector<32x128xf32>
    %cst_31 = arith.constant 0.000000e+00 : f32
    %95 = vector.shape_cast %41 : vector<32x1xi1> to vector<32x1xi1>
    %96 = vector.broadcast %95 : vector<32x1xi1> to vector<32x128xi1>
    %97 = vector.broadcast %cst_31 : f32 to vector<32x128xf32>
    %98 = arith.select %96, %77, %97 : vector<32x128xi1>, vector<32x128xf32>
    %99 = arith.addf %60, %98 : vector<32x128xf32>
    %cst_32 = arith.constant 0.000000e+00 : f32
    %100 = vector.shape_cast %43 : vector<32x1xi1> to vector<32x1xi1>
    %101 = vector.broadcast %100 : vector<32x1xi1> to vector<32x128xi1>
    %102 = vector.broadcast %cst_32 : f32 to vector<32x128xf32>
    %103 = arith.select %101, %94, %102 : vector<32x128xi1>, vector<32x128xf32>
    %104 = arith.addf %99, %103 : vector<32x128xf32>
    %c0_33 = arith.constant 0 : index
    %c0_34 = arith.constant 0 : index
    %105 = vector.load %arg6[%c0_33, %c0_34] : memref<1x128xf32, #tpu.memory_space<vmem>>, vector<1x128xf32>
    %106 = vector.broadcast %105 : vector<1x128xf32> to vector<32x128xf32>
    %107 = arith.addf %104, %106 : vector<32x128xf32>
    %108 = arith.truncf %107 : vector<32x128xf32> to vector<32x128xbf16>
    %c0_35 = arith.constant 0 : index
    %c0_36 = arith.constant 0 : index
    %109 = vector.load %arg7[%c0_35, %c0_36] : memref<128x64xbf16, #tpu.memory_space<vmem>>, vector<128x64xbf16>
    %cst_37 = arith.constant dense<0.000000e+00> : vector<32x64xf32>
    %110 = tpu.matmul %108, %109, %cst_37 {dimension_numbers = #tpu.dot_dimension_numbers<[1], [0], [0], [1], [0, 0, 1, 1], [], []>} : vector<32x128xbf16>, vector<128x64xbf16>, vector<32x64xf32> -> vector<32x64xf32>
    %c0_38 = arith.constant 0 : index
    %c0_39 = arith.constant 0 : index
    %111 = vector.load %arg8[%c0_38, %c0_39] : memref<1x64xf32, #tpu.memory_space<vmem>>, vector<1x64xf32>
    %112 = vector.broadcast %111 : vector<1x64xf32> to vector<32x64xf32>
    %113 = arith.addf %110, %112 : vector<32x64xf32>
    %c0_40 = arith.constant 0 : index
    %c0_41 = arith.constant 0 : index
    %c0_42 = arith.constant 0 : index
    %114 = vector.load %arg9[%c0_40, %c0_41, %c0_42] : memref<1x32x64xf32, #tpu.memory_space<vmem>>, vector<1x32x64xf32>
    %115 = vector.shape_cast %114 : vector<1x32x64xf32> to vector<32x64xf32>
    %116 = vector.shape_cast %113 : vector<32x64xf32> to vector<1x32x64xf32>
    tpu.vector_store %arg9[%c0_40, %c0_41, %c0_42], %116 {strides = array<i32>} : memref<1x32x64xf32, #tpu.memory_space<vmem>>, vector<1x32x64xf32>,
    return
  }
  func.func @transform_0(%arg0: i32, %arg1: i32) -> (i32, i32, i32) {
    %c0_i32 = arith.constant 0 : i32
    %c0_i32_0 = arith.constant 0 : i32
    %c0_i32_1 = arith.constant 0 : i32
    return %arg0, %c0_i32, %c0_i32_0 : i32, i32, i32
  }
  func.func @transform_1(%arg0: i32, %arg1: i32) -> (i32, i32) {
    %c0_i32 = arith.constant 0 : i32
    %c0_i32_0 = arith.constant 0 : i32
    %c0_i32_1 = arith.constant 0 : i32
    return %c0_i32, %c0_i32_0 : i32, i32
  }
  func.func @transform_2(%arg0: i32, %arg1: i32) -> (i32, i32) {
    %c0_i32 = arith.constant 0 : i32
    %c0_i32_0 = arith.constant 0 : i32
    %c0_i32_1 = arith.constant 0 : i32
    return %c0_i32, %c0_i32_0 : i32, i32
  }
  func.func @transform_3(%arg0: i32, %arg1: i32) -> (i32, i32) {
    %c0_i32 = arith.constant 0 : i32
    %c0_i32_0 = arith.constant 0 : i32
    %c0_i32_1 = arith.constant 0 : i32
    return %c0_i32, %c0_i32_0 : i32, i32
  }
  func.func @transform_4(%arg0: i32, %arg1: i32) -> (i32, i32) {
    %c0_i32 = arith.constant 0 : i32
    %c0_i32_0 = arith.constant 0 : i32
    %c0_i32_1 = arith.constant 0 : i32
    return %c0_i32, %c0_i32_0 : i32, i32
  }
  func.func @transform_5(%arg0: i32, %arg1: i32) -> (i32, i32) {
    %c0_i32 = arith.constant 0 : i32
    %c0_i32_0 = arith.constant 0 : i32
    %c0_i32_1 = arith.constant 0 : i32
    return %c0_i32, %c0_i32_0 : i32, i32
  }
  func.func @transform_6(%arg0: i32, %arg1: i32) -> (i32, i32) {
    %c0_i32 = arith.constant 0 : i32
    %c0_i32_0 = arith.constant 0 : i32
    %c0_i32_1 = arith.constant 0 : i32
    return %c0_i32, %c0_i32_0 : i32, i32
  }
  func.func @transform_7(%arg0: i32, %arg1: i32) -> (i32, i32, i32) {
    %c0_i32 = arith.constant 0 : i32
    %c0_i32_0 = arith.constant 0 : i32
    return %arg0, %arg1, %c0_i32 : i32, i32, i32
  }
}

</mosaic_0001>

<bundles_post_ra>
// kernel: tpu_custom_call.1
= control target key start
LH: loop header
LB: loop body
LE: loop exit
PB: predicated region body
PF: predicated region fallthrough
CT: control target
= control target key end

     0   :  { %12 = vsyncpa [#allocation4], 0  ;;  %s1750_s0 = inlined_call_operand.vmem [shape: bf16[2,80,64], index: 0, kind: input, shape index: {}]   ;;  %s1751_s1 = inlined_call_operand.vmem [shape: bf16[64,128], index: 1, kind: input, shape index: {}]   ;;  %s1752_s2 = inlined_call_operand.vmem [shape: f32[1,128], index: 2, kind: input, shape index: {}]   ;;  %s1753_s3 = inlined_call_operand.vmem [shape: f32[9,128], index: 3, kind: input, shape index: {}]   ;;  %s1754_s4 = inlined_call_operand.vmem [shape: f32[1,128], index: 4, kind: input, shape index: {}]   ;;  %s1755_s5 = inlined_call_operand.vmem [shape: bf16[128,64], index: 5, kind: input, shape index: {}]   ;;  %s1756_s6 = inlined_call_operand.vmem [shape: f32[1,64], index: 6, kind: input, shape index: {}]   ;;  %s1757_s7 = inlined_call_operand.hbm [shape: f32[2,64,64], index: 7, kind: output, shape index: {}]  }
   0x1   :  { %14 = vsyncpa [#allocation4 + $0x1], 0  ;;  %s1343_s24 = smov 0   ;;  %s1345_s25 = smov 0  }
   0x2   :  { %s1347_s26 = smov 0   ;;  %s1349_s27 = smov 0  }
   0x3   :  { %s1351_s28 = smov 0   ;;  %s1353_s29 = smov 0  }
   0x4   :  { %s1355_s30 = smov 0   ;;  %s1357_s8 = smov 0  }
   0x5 LB: > { %1763 = sst [smem:[#allocation6_spill]] %s1286_s29  ;;  %s979_s9 = sadd.s32 4294967295, %s1294_s8   ;;  %s1294_s8 = sphi %s1357_s8, %s20_s8   ;;  %s1290_s30 = sphi %s1355_s30, %s1785_s30   ;;  %s1286_s29 = sphi %s1353_s29, %s1784_s29   ;;  %s1282_s28 = sphi %s1351_s28, %s1783_s28   ;;  %s1278_s27 = sphi %s1349_s27, %s1782_s27   ;;  %s1274_s26 = sphi %s1347_s26, %s1788_s26   ;;  %s1270_s25 = sphi %s1345_s25, %s1787_s25   ;;  %s1266_s24 = sphi %s1343_s24, %s1786_s24  }
   0x6   : > { %1764 = sst [smem:[#allocation7_spill]] %s1290_s30  ;;  %s980_s10 = sadd.s32 4294967294, %s1294_s8  }
   0x7   : > { %s29_s11 = sadd.s32 1, %s1286_s29  ;;  %s32_s12 = sadd.s32 1, %s1290_s30 }
   0x8   : > { %p30_p0 = scmp.ge.s32.totalorder %s29_s11, 2  ;;  %p203_p1 = scmp.ne.s32.totalorder %s1274_s26, %s1270_s25 }
   0x9   : > { %p204_p2 = scmp.eq.s32.totalorder %s979_s9, 3  ;;  %p209_p5 = scmp.ne.s32.totalorder %s1270_s25, %s1266_s24 }
   0xa   : > { %s1790_s11 = smov (%p30_p0, %s29_s11), 0  ;;  %s1792_s12 = smov (!%p30_p0, %s32_s12), %s1290_s30 }
   0xb   : > { %1765 = sst [smem:[#allocation8_spill]] %s1790_s11  ;;  %s189_s13 = ssub.s32 %s1286_s29, %s1790_s11 }
   0xc   : > { %p1394_p3 = por %p204_p2, %p203_p1  ;;  %p34_p4 = scmp.ge.s32.totalorder %s1792_s12, 2 }
   0xd   : > { %p210_p6 = scmp.eq.s32.totalorder %s980_s10, 3  ;;  %p983_p7 = scmp.ge.s32.totalorder %s1294_s8, 1 }
   0xe   : > { %s1794_s12 = smov (%p34_p4, %s1792_s12), 0  ;;  %p254_p9 = scmp.lt.s32.totalorder %s1294_s8, 5 }
   0xf   : > { %1767 = sst [smem:[#allocation9_spill]] %s1794_s12  ;;  %p1403_p8 = por %p210_p6, %p209_p5 }
  0x10   : > { %s188_s16 = ssub.s32 %s1290_s30, %s1794_s12  ;;  %s193_s17 = sadd.s32 1, %s1274_s26 }
  0x11   : > { %s190_s18 = sor.u32 %s189_s13, %s188_s16  ;;  %p255_p10 = pnand %p983_p7, %p254_p9 }
  0x12   : > { %p191_p11 = scmp.eq.s32.totalorder %s190_s18, 0  ;;  %s1758_s20 = sand.u32 (!%p255_p10), 1, %s1270_s25  }
  0x13   : > { %258 = sbr.rel (%p255_p10) target bundleno = 537 (0x219), region = 48  ;;  %s1417_s21 = sshll.u32 (!%p255_p10), %s1758_s20, 5 }
  0x14   : > { %s1412_s19 = scalar_select %p191_p11, %s1274_s26, %s193_s17  }
  0x15   : > { %p286_p12 = scmp.lt.s32.totalorder (!%p255_p10), %s1282_s28, 1  ;;  %s986_s13 = sshll.u32 (!%p255_p10), %s1278_s27, 5 }
  0x16   : > { %s294_s16 = sshra.s32 (!%p255_p10), %s986_s13, 3  ;;  %p1005_p13 = scmp.ne.s32.totalorder (!%p255_p10), %s1278_s27, 0 }
  0x17   : > { %s987_s23 = sshll.u32 (!%p255_p10), %s294_s16, 2 }
  0x18   : > { %v1296_v0 = vmov 0.0   ;;  %v1187_v1 = vld [vmem:[%s1751_s1 + $0x18] sm:$0xff]   ;;  %v1188_v2 = vld [vmem:[%s1751_s1 + $0x10] sm:$0xff]   ;;  %vm1297_vm0 = vmmov 0   ;;  %s287_s17 = scalar_select %p286_p12, %s1282_s28, 1  ;;  %v1189_v3 = vld [vmem:[%s1751_s1 + $0x8] sm:$0xff]  }
  0x19   : > { %1069 = vmatprep.subr.bf16.mxu0 %v1296_v0  ;;  %1077 = vmatprep.mubr.msk.bf16.mxu0 %vm1297_vm0, %v1296_v0  ;;  %v1190_v4 = vld [vmem:[%s1751_s1] sm:$0xff]   ;;  %vm358_vm1 = vcmask 523264  }
  0x1a   : > { %1070 = vmatpush3.bf16.msra.mxu0 %v1187_v1  ;;  %s1109_s22 = smul.u32 40, %s287_s17  ;;  %v988_v8 = vld [vmem:[%s1752_s2] ss:$0 sm:$0xff] }
  0x1b   : > { %1071 = vmatprep.subr.bf16.mxu0 %v1296_v0 }
  0x1c   : > { %s290_s9 = scalar_lea.vmem %s1750_s0, %s1109_s22 }
  0x1d   : > { %s297_s29 = scalar_lea.vmem %s290_s9, %s987_s23 }
  0x1e   : > { %1072 = vmatpush3.bf16.msra.mxu0 %v1188_v2  ;;  %v1191_v5 = vld [vmem:[%s297_s29] sm:$0xff]   ;;  %v1192_v6 = vld [vmem:[%s297_s29 + $0x8] sm:$0xff]   ;;  %v1193_v7 = vld [vmem:[%s297_s29 + $0x10] sm:$0xff]   ;;  %s1447_s29 = scalar_lea.vmem [#allocation3], %s1417_s21 }
  0x1f   : > { %1073 = vmatprep.subr.bf16.mxu0 %v1296_v0 }
  0x22   : > { %1074 = vmatpush3.bf16.msra.mxu0 %v1189_v3 }
  0x23   : > { %1075 = vmatprep.subr.bf16.mxu0 %v1296_v0 }
  0x26   : > { %1076 = vmatpush3.bf16.msra.mxu0 %v1190_v4 }
  0x29   : > { %1078 = vmatmul.mubr.msk.bf16.vlgmr.msra.gmra.mxu0 %vm358_vm1, %v1191_v5 }
  0x2a   : > { %1081 = vmatprep.mubr.msk.bf16.mxu0 %vm1297_vm0, %v1296_v0 }
  0x31   : > { %1082 = vmatmul.mubr.msk.bf16.gmra.mxu0 %vm358_vm1, %v1192_v6 }
  0x32   : > { %1085 = vmatprep.mubr.msk.bf16.mxu0 %vm1297_vm0, %v1296_v0 }
  0x39   : > { %1086 = vmatmul.mubr.msk.bf16.gmra.mxu0 %vm358_vm1, %v1193_v7 }
  0xe9   : > { %v402_v9 = vpop.f32.mrf.mxu0 }
  0xea   : > { %v403_v10 = vadd.f32 %v988_v8, %v402_v9 }
  0xeb   : > { %v1079_v11 = vpop.f32.mrf.mxu0 }
  0xec   : > { %v1024_v12 = vpack.c.bf16 %v403_v10, %v403_v10 }
  0xed   : > { %v405_v13 = vpop.f32.mrf.mxu0 }
  0xee   : > { %449 = vst [vmem:[#allocation2 + $0x4] sm:$0xf] %v1024_v12  ;;  %v406_v16 = vadd.f32 %v988_v8, %v405_v13 }
  0xef   : > { %v1080_v14 = vpop.f32.mrf.mxu0 }
  0xf1   : > { %v410_v15 = vpop.f32.mrf.mxu0 }
  0xf2   : > { %v411_v17 = vadd.f32 %v988_v8, %v410_v15 }
  0xf3   : > { %v1083_v18 = vpop.f32.mrf.mxu0 }
  0xf4   : > { %v1033_v19 = vpack.c.bf16 %v411_v17, %v406_v16 }
  0xf5   : > { %v413_v20 = vpop.f32.mrf.mxu0 }
  0xf6   : > { %1048 = vst [vmem:[#allocation2 + $0x8] sm:$0xff] %v1033_v19   ;;  %v414_v23 = vadd.f32 %v988_v8, %v413_v20 }
  0xf7   : > { %v1084_v21 = vpop.f32.mrf.mxu0 }
  0xf9   : > { %v418_v22 = vpop.f32.mrf.mxu0 }
  0xfa   : > { %v419_v24 = vadd.f32 %v988_v8, %v418_v22 }
  0xfb   : > { %v1087_v25 = vpop.f32.mrf.mxu0 }
  0xfc   : > { %v1038_v26 = vpack.c.bf16 %v419_v24, %v414_v23 }
  0xfd   : > { %v421_v27 = vpop.f32.mrf.mxu0 }
  0xfe   : > { %1049 = vst [vmem:[#allocation2 + $0x10] sm:$0xff] %v1038_v26   ;;  %v422_v28 = vadd.f32 %v988_v8, %v421_v27  ;;  %458 = sbr.rel (%p1005_p13) target bundleno = 261 (0x105), region = 52 }
  0xff   : > { %v1088_v29 = vpop.f32.mrf.mxu0 }
 0x100   : > { %v1029_v30 = vpack.c.bf16 %v422_v28, %v422_v28 }
 0x102   : > { %454 = vst [vmem:[#allocation2 + $0x18] sm:$0xf] %v1029_v30 }
 0x103   : > { %v1298_v31 = vmov 0  }
 0x104   : > { %459 = vst [vmem:[#allocation2 + $0x4] sm:$0xf] %v1298_v31 }
 0x105 PF: > { %p1006_p0 = scmp.ne.s32.totalorder %s1278_s27, 1 }
 0x107   : > { %463 = sbr.rel (%p1006_p0) target bundleno = 270 (0x10e), region = 56 }
 0x10c   : > { %v1299_v32 = vmov 0  }
 0x10d   : > { %464 = vst [vmem:[#allocation2 + $0x18] sm:$0xf] %v1299_v32 }
 0x10e PF: > { %v1194_v33 = vld [vmem:[%s1755_s5 + $0x38] sm:$0xff]   ;;  %v479_v34 = vlaneseq  ;;  %v1195_v35 = vld [vmem:[%s1755_s5 + $0x30] sm:$0xff]   ;;  %v1196_v36 = vld [vmem:[%s1755_s5 + $0x28] sm:$0xff]   ;;  %vm465_vm2 = vcmask 1043459   ;;  %vm471_vm3 = vcmask 1040384   ;;  %vm726_vm10 = vcmask 1046528  }
 0x10f   : > { %1089 = vmatprep.subr.bf16.mxu1 %v1194_v33  ;;  %v1197_v39 = vld [vmem:[%s1755_s5 + $0x20] sm:$0xff]   ;;  %vm466_vm4 = vsmask.f32 7950  ;;  %vm472_vm5 = vsmask.f32 256  ;;  %v1050_v49 = vld [vmem:[#allocation2 + $0x8] sm:$0xff]  }
 0x110   : > { %1090 = vmatpush3.bf16.msra.mxu1 %v1194_v33  ;;  %v1460_v37 = vshrl.u32 %v479_v34, 7  ;;  %v468_v40 = vld [vmem:[#allocation2] sm:$0x8]  ;;  %vm467_vm6 = vmand %vm465_vm2, %vm466_vm4  ;;  %v474_v41 = vld [vmem:[#allocation2 + $0x1c] sm:$0x1]  ;;  %v1484_v54 = vunpack.c.l.bf16 %v1050_v49  ;;  %v1486_v55 = vunpack.c.h.bf16 %v1050_v49  ;;  %s1019_s9 = sshll.u32 %s1278_s27, 2 }
 0x111   : > { %1091 = vmatprep.subr.bf16.mxu1 %v1195_v35  ;;  %v469_v42 = vsel %vm467_vm6, 0, %v468_v40  ;;  %vm473_vm7 = vmand %vm471_vm3, %vm472_vm5  ;;  %v1471_v45 = vld [vmem:[#allocation2 + $0x4] ss:$8 sps:$4 sm:$0xff]   ;;  %v1477_v50 = vld [vmem:[#allocation2 + $0x10] sm:$0xff]   ;;  %s1020_s10 = sshll.u32 %s1282_s28, 3  ;;  %s901_s13 = sshll.u32 %s1447_s29, 4  ;;  %s1691_s13 = int_to_ptr.vmem [resolvable:$true] %s901_s13 }
 0x112   : > { %v1463_v38 = vadd.s32 8, %v1460_v37  ;;  %v488_v43 = vand.u32 7, %v1460_v37  ;;  %v550_v46 = vsub.s32 1, %v1460_v37  ;;  %470 = vst [vmem:[#allocation2] sm:$0x8] %v469_v42  ;;  %v475_v47 = vsel %vm473_vm7, 0, %v474_v41  ;;  %s898_s12 = sadd.s32 %s1020_s10, %s1019_s9 }
 0x113   : > { %v477_v48 = vld [vmem:[%s1753_s3] sm:$0xff]  ;;  %v560_v51 = vsub.s32 4, %v1460_v37  ;;  %v574_v52 = vsub.s32 7, %v1460_v37  ;;  %v1198_v53 = vld [vmem:[%s1755_s5 + $0x18] sm:$0xff]   ;;  %476 = vst [vmem:[#allocation2 + $0x1c] sm:$0x1] %v475_v47  ;;  %v544_v56 = vunpack.c.l.bf16 %v1471_v45  ;;  %v1492_v60 = vunpack.c.l.bf16 %v1477_v50 }
 0x114   : > { %1092 = vmatpush3.bf16.msra.mxu1 %v1195_v35  ;;  %v495_v44 = vand.u32 7, %v1463_v38  ;;  %v1489_v57 = vrot.slane %v477_v48, %v550_v46  ;;  %v595_v58 = vld [vmem:[#allocation2 + $0x4] sm:$0x8]  ;;  %v611_v59 = vld [vmem:[#allocation2 + $0x8] sm:$0x8]  ;;  %v588_v63 = vsub.s32 0, %v1460_v37 }
 0x115   : > { %1093 = vmatprep.subr.bf16.mxu1 %v1196_v36  ;;  %v1494_v61 = vrot.slane %v477_v48, %v560_v51  ;;  %v1496_v62 = vrot.slane %v477_v48, %v574_v52  ;;  %v596_v2 = vunpack.c.l.bf16 %v595_v58  ;;  %v599_v3 = vsub.s32 3, %v1460_v37  ;;  %v1051_v8 = vld [vmem:[#allocation2 + $0x10] sm:$0xff]   ;;  %v1200_v29 = vld [vmem:[%s1755_s5 + $0x8] sm:$0xff]   ;;  %v1201_v52 = vld [vmem:[%s1755_s5] sm:$0xff]   ;;  %s1021_s20 = sshll.u32 %s898_s12, 7  ;;  %s1781_s16 = sand.u32 1, %s1270_s25  }
 0x116   : > { %v552_v0 = vmul.f32 %v1489_v57, %v544_v56  ;;  %v553_v1 = vmul.f32 %v1484_v54, %v1489_v57  ;;  %v612_v7 = vunpack.c.l.bf16 %v611_v59  ;;  %v1199_v9 = vld [vmem:[%s1755_s5 + $0x10] sm:$0xff]   ;;  %v1512_v10 = vrot.slane %v477_v48, %v588_v63  ;;  %v1555_v40 = vld [vmem:[%s1753_s3 + $0x8] ss:$0 sm:$0xff]  ;;  %v570_v23 = vld [vmem:[#allocation2 + $0x18] sm:$0xf]  ;;  %s1689_s21 = scalar_lea.hbm %s1757_s7, %s1021_s20  ;;  %s1699_s17 = scalar_lea.sflag [#allocation4], %s1781_s16 }
 0x117   : > { %v562_v4 = vmul.f32 %v1484_v54, %v1494_v61  ;;  %v563_v5 = vmul.f32 %v1486_v55, %v1494_v61  ;;  %v576_v6 = vmul.f32 %v1486_v55, %v1496_v62  ;;  %v1514_v11 = vrot.slane %v477_v48, %v599_v3  ;;  %s1202_s18 = scalar_lea.vmem %s1691_s13, 512  ;;  %s1300_s22 = smov [#allocation3]  }
 0x118   : > { %1094 = vmatpush3.bf16.msra.mxu1 %v1196_v36  ;;  %v615_v12 = vsub.s32 6, %v1460_v37  ;;  %v631_v13 = vsub.s32 2, %v1460_v37  ;;  %v577_v16 = vmul.f32 %v1496_v62, %v1492_v60  ;;  %v642_v17 = vsub.s32 5, %v1460_v37  ;;  %p1203_p1 = scmp.ne.s32.totalorder %s1691_s13, %s1202_s18  ;;  %s1206_s23 = sshll.u32 %s1300_s22, 4  ;;  %s1207_s23 = int_to_ptr.vmem [resolvable:$false] %s1206_s23 }
 0x119   : > { %1095 = vmatprep.subr.bf16.mxu1 %v1197_v39  ;;  %v566_v14 = vadd.f32 %v562_v4, %v552_v0  ;;  %v567_v15 = vadd.f32 %v563_v5, %v553_v1  ;;  %v584_v18 = vld [vmem:[#allocation2] sm:$0x8]  ;;  %v591_v19 = vmul.f32 %v1512_v10, %v544_v56  ;;  %v592_v20 = vmul.f32 %v1484_v54, %v1512_v10  ;;  %s1208_s9 = scalar_lea.vmem %s1207_s23, 1024  ;;  %p1209_p5 = scmp.lt.s32.totalorder %s1691_s13, %s1207_s23 }
 0x11a   : > { %v602_v21 = vmul.f32 %v1484_v54, %v1514_v11  ;;  %v1046_v22 = vunpack.c.l.bf16 %v1051_v8  ;;  %vm1528_vm8 = vcmp.gt.s32.totalorder %v488_v43, 0  ;;  %vm1534_vm9 = vcmp.gt.s32.totalorder %v495_v44, 0  ;;  %p1204_p2 = pnand %p1203_p1, %p1394_p3  ;;  %p1210_p6 = scmp.lt.s32.totalorder %s1208_s9, %s1202_s18 }
 0x11b   : > { %v580_v25 = vadd.f32 %v576_v6, %v566_v14  ;;  %v585_v26 = vunpack.c.l.bf16 %v584_v18  ;;  %v601_v27 = vmul.f32 %v1514_v11, %v596_v2  ;;  %v603_v28 = vmul.f32 %v1486_v55, %v1514_v11 }
 0x11c   : > { %1096 = vmatpush3.bf16.msra.mxu1 %v1197_v39  ;;  %v607_v30 = vadd.f32 %v602_v21, %v591_v19  ;;  %v1544_v31 = vrot.slane %v477_v48, %v615_v12  ;;  %v1546_v32 = vrot.slane %v477_v48, %v631_v13  ;;  %v1548_v33 = vrot.slane %v477_v48, %v642_v17  ;;  %p1205_p4 = pneg %p1204_p2  ;;  %p1211_p7 = por %p1210_p6, %p1209_p5 }
 0x11d   : > { %1097 = vmatprep.subr.bf16.mxu1 %v1198_v53  ;;  %v590_v34 = vmul.f32 %v1512_v10, %v585_v26  ;;  %v608_v35 = vadd.f32 %v603_v28, %v592_v20  ;;  %v1047_v36 = vunpack.c.h.bf16 %v1051_v8  ;;  %v659_v39 = vunpack.c.h.bf16 %v1471_v45 }
 0x11e   : > { %vm1559_vm11 = vcmp.lt.s32.totalorder %v488_v43, 7  ;;  %v617_v42 = vmul.f32 %v1544_v31, %v612_v7  ;;  %v618_v46 = vmul.f32 %v1486_v55, %v1544_v31  ;;  %v619_v45 = vmul.f32 %v1544_v31, %v1492_v60  ;;  %p1212_p9 = pnand %p1211_p7, %p1205_p4 }
 0x11f   : > { %v633_v47 = vmul.f32 %v1546_v32, %v544_v56  ;;  %v606_v48 = vadd.f32 %v601_v27, %v590_v34  ;;  %v634_v49 = vmul.f32 %v1484_v54, %v1546_v32  ;;  %v635_v43 = vmul.f32 %v1486_v55, %v1546_v32 }
 0x120   : > { %1098 = vmatpush3.bf16.msra.mxu1 %v1198_v53  ;;  %v644_v51 = vmul.f32 %v1484_v54, %v1548_v33  ;;  %v623_v53 = vadd.f32 %v618_v46, %v607_v30  ;;  %v1578_v58 = vadd.f32 %v619_v45, %v608_v35  ;;  %v645_v56 = vmul.f32 %v1486_v55, %v1548_v33 }
 0x121   : > { %1099 = vmatprep.subr.bf16.mxu1 %v1199_v9  ;;  %v646_v59 = vmul.f32 %v1548_v33, %v1492_v60  ;;  %v622_v63 = vadd.f32 %v617_v42, %v606_v48  ;;  %v668_v1 = vmul.f32 %v1555_v40, %v659_v39  ;;  %v669_v54 = vmul.f32 %v1046_v22, %v1555_v40 }
 0x122   : > { %v649_v0 = vadd.f32 %v644_v51, %v633_v47  ;;  %v650_v2 = vadd.f32 %v645_v56, %v634_v49  ;;  %v670_v4 = vmul.f32 %v1047_v36, %v1555_v40  ;;  %v693_v5 = vrot.slane %v623_v53, 7  ;;  %v627_v51 = vld [vmem:[#allocation2 + $0x14] sm:$0x1]  ;;  %v638_v56 = vld [vmem:[#allocation2 + $0x18] sm:$0x1] }
 0x123   : > { %v651_v3 = vadd.f32 %v646_v59, %v635_v43  ;;  %v581_v6 = vadd.f32 %v577_v16, %v567_v15  ;;  %v692_v8 = vrot.slane %v622_v63, 7  ;;  %vm1590_vm12 = vcmp.lt.s32.totalorder %v495_v44, 7 }
 0x124   : > { %1100 = vmatpush3.bf16.msra.mxu1 %v1199_v9  ;;  %v673_v7 = vadd.f32 %v668_v1, %v649_v0  ;;  %v695_v9 = vrot.slane %v1578_v58, 7  ;;  %v674_v13 = vadd.f32 %v669_v54, %v650_v2  ;;  %v1597_v17 = vadd.s32 16, %v1460_v37  ;;  %v658_v54 = vld [vmem:[#allocation2 + $0x1c] sm:$0x1] }
 0x125   : > { %1101 = vmatprep.subr.bf16.mxu1 %v1200_v29  ;;  %v1594_v14 = vadd.f32 %v670_v4, %v651_v3  ;;  %v694_v18 = vsel %vm471_vm3, %v692_v8, %v693_v5  ;;  %v1604_v19 = vadd.s32 24, %v1460_v37  ;;  %v554_v37 = vmul.f32 %v1486_v55, %v1489_v57 }
 0x126   : > { %v696_v15 = vsel %vm471_vm3, %v693_v5, %v695_v9  ;;  %v727_v16 = vrot.slane %v673_v7, 1  ;;  %v705_v38 = vsel %vm1528_vm8, %v694_v18, 0.0  ;;  %v728_v20 = vrot.slane %v674_v13, 1 }
 0x127   : > { %v706_v44 = vsel %vm1534_vm9, %v696_v15, 0.0  ;;  %v730_v21 = vrot.slane %v1594_v14, 1  ;;  %v709_v22 = vadd.f32 %v705_v38, %v580_v25  ;;  %v1624_v25 = vld [vmem:[%s1754_s4] ss:$0 sm:$0xff]  ;;  %v502_v30 = vand.u32 7, %v1597_v17 }
 0x128   : > { %1102 = vmatpush3.bf16.msra.mxu1 %v1200_v29  ;;  %v710_v26 = vadd.f32 %v706_v44, %v581_v6  ;;  %v729_v27 = vsel %vm726_vm10, %v727_v16, %v728_v20  ;;  %v509_v34 = vand.u32 7, %v1604_v19  ;;  %v557_v39 = vunpack.c.h.bf16 %v1477_v50  ;;  %v1009_v14 = vld [vmem:[%s1756_s6] ss:$0 sm:$0xff] }
 0x129   : > { %1103 = vmatprep.subr.bf16.mxu1 %v1201_v52  ;;  %v731_v28 = vsel %vm726_vm10, %v728_v20, %v730_v21  ;;  %v740_v24 = vsel %vm1559_vm11, %v729_v27, 0.0  ;;  %v564_v41 = vmul.f32 %v1494_v61, %v1492_v60  ;;  %v571_v42 = vunpack.c.l.bf16 %v570_v23 }
 0x12a   : > { %v741_v29 = vsel %vm1590_vm12, %v731_v28, 0.0  ;;  %v744_v35 = vadd.f32 %v740_v24, %v709_v22  ;;  %v593_v46 = vmul.f32 %v1486_v55, %v1512_v10  ;;  %v594_v45 = vmul.f32 %v1512_v10, %v1492_v60 }
 0x12b   : > { %v745_v36 = vadd.f32 %v741_v29, %v710_v26  ;;  %v604_v47 = vmul.f32 %v1514_v11, %v1492_v60  ;;  %v555_v50 = vmul.f32 %v1489_v57, %v1492_v60  ;;  %v565_v43 = vmul.f32 %v1494_v61, %v557_v39  ;;  %v657_v57 = vld [vmem:[#allocation2 + $0x18] sm:$0xf] }
 0x12c   : > { %1104 = vmatpush3.bf16.msra.mxu1 %v1201_v52  ;;  %v755_v48 = vadd.f32 %v1624_v25, %v744_v35  ;;  %vm1642_vm13 = vcmp.gt.s32.totalorder %v502_v30, 0  ;;  %v568_v55 = vadd.f32 %v564_v41, %v554_v37  ;;  %v605_v10 = vmul.f32 %v1514_v11, %v557_v39 }
 0x12d   : > { %v756_v49 = vadd.f32 %v1624_v25, %v745_v36  ;;  %v609_v53 = vadd.f32 %v604_v47, %v593_v46  ;;  %v578_v63 = vmul.f32 %v1496_v62, %v557_v39  ;;  %v620_v0 = vmul.f32 %v1544_v31, %v557_v39 }
 0x12e   : > { %v621_v1 = vmul.f32 %v1544_v31, %v571_v42  ;;  %v579_v61 = vmul.f32 %v1496_v62, %v571_v42  ;;  %v610_v2 = vadd.f32 %v605_v10, %v594_v45  ;;  %v628_v3 = vunpack.c.l.bf16 %v627_v51 }
 0x12f   : > { %v759_v59 = vpack.c.bf16 %v756_v49, %v755_v48  ;;  %v636_v4 = vmul.f32 %v1546_v32, %v1492_v60  ;;  %v569_v11 = vadd.f32 %v565_v43, %v555_v50  ;;  %v625_v5 = vadd.f32 %v620_v0, %v609_v53 }
 0x130   : > { %v639_v6 = vunpack.c.l.bf16 %v638_v56  ;;  %v647_v7 = vmul.f32 %v1548_v33, %v557_v39  ;;  %v626_v8 = vadd.f32 %v621_v1, %v610_v2  ;;  %v637_v12 = vmul.f32 %v1546_v32, %v628_v3 }
 0x131   : > { %1105 = vmatprep.mubr.bf16.mxu1 %v759_v59  ;;  %v662_v13 = vunpack.c.l.bf16 %v657_v57  ;;  %v663_v31 = vunpack.c.l.bf16 %v658_v54  ;;  %vm1655_vm14 = vcmp.gt.s32.totalorder %v509_v34, 0  ;;  %v697_v15 = vrot.slane %v625_v5, 7 }
 0x132   : > { %v648_v62 = vmul.f32 %v1548_v33, %v639_v6  ;;  %v652_v18 = vadd.f32 %v647_v7, %v636_v4  ;;  %v582_v60 = vadd.f32 %v578_v63, %v568_v55  ;;  %v699_v38 = vrot.slane %v626_v8, 7 }
 0x133   : > { %v671_v16 = vmul.f32 %v1555_v40, %v662_v13  ;;  %v672_v19 = vmul.f32 %v1555_v40, %v663_v31  ;;  %v583_v44 = vadd.f32 %v579_v61, %v569_v11  ;;  %v698_v32 = vsel %vm471_vm3, %v695_v9, %v697_v15 }
 0x134   : > { %v653_v20 = vadd.f32 %v648_v62, %v637_v12  ;;  %v700_v26 = vsel %vm471_vm3, %v697_v15, %v699_v38  ;;  %v707_v33 = vsel %vm1642_vm13, %v698_v32, 0.0  ;;  %vm538_vm15 = vcmp.lt.s32.totalorder %v502_v30, 7 }
 0x135   : > { %v676_v22 = vadd.f32 %v671_v16, %v652_v18  ;;  %v708_v28 = vsel %vm1655_vm14, %v700_v26, 0.0  ;;  %v711_v40 = vadd.f32 %v707_v33, %v582_v60  ;;  %vm539_vm0 = vcmp.lt.s32.totalorder %v509_v34, 7 }
 0x136   : > { %v677_v27 = vadd.f32 %v672_v19, %v653_v20  ;;  %v712_v23 = vadd.f32 %v708_v28, %v583_v44 }
 0x137   : > { %v732_v37 = vrot.slane %v676_v22, 1 }
 0x138   : > { %v734_v58 = vrot.slane %v677_v27, 1 }
 0x139   : > { %v733_v9 = vsel %vm726_vm10, %v730_v21, %v732_v37 }
 0x13a   : > { %v735_v24 = vsel %vm726_vm10, %v732_v37, %v734_v58  ;;  %v742_v29 = vsel %vm538_vm15, %v733_v9, 0.0 }
 0x13b   : > { %v743_v35 = vsel %vm539_vm0, %v735_v24, 0.0  ;;  %v746_v36 = vadd.f32 %v742_v29, %v711_v40 }
 0x13c   : > { %v747_v39 = vadd.f32 %v743_v35, %v712_v23 }
 0x13d   : > { %v757_v30 = vadd.f32 %v1624_v25, %v746_v36 }
 0x13e   : > { %v758_v41 = vadd.f32 %v1624_v25, %v747_v39 }
 0x140   : > { %v760_v34 = vpack.c.bf16 %v758_v41, %v757_v30 }
 0x142   : > { %1106 = vmatmul.mubr.bf16.vlgmr.msra.gmra.mxu1 %v760_v34 }
 0x202   : > { %v1107_v21 = vpop.f32.mrf.mxu1 }
 0x203   : > { %v875_v42 = vadd.f32 %v1107_v21, %v1009_v14 }
 0x204   : > { %v866_v46 = vpop.f32.mrf.mxu1 }
 0x205   : > { %883 = vst.msk [vmem:[%s1447_s29 + $0x10] sm:$0xff] %vm358_vm1, %v875_v42  ;;  %v867_v45 = vadd.f32 %v1009_v14, %v866_v46 }
 0x206   : > { %v1108_v25 = vpop.f32.mrf.mxu1 }
 0x207   : > { %881 = vst.msk [vmem:[%s1447_s29] sm:$0xff] %vm358_vm1, %v867_v45  ;;  %v878_v47 = vadd.f32 %v1108_v25, %v1009_v14 }
 0x208   : > { %v869_v48 = vpop.f32.mrf.mxu1 }
 0x209   : > { %884 = vst.msk [vmem:[%s1447_s29 + $0x18] sm:$0xff] %vm358_vm1, %v878_v47  ;;  %v870_v49 = vadd.f32 %v1009_v14, %v869_v48 }
 0x20b   : > { %882 = vst.msk [vmem:[%s1447_s29 + $0x8] sm:$0xff] %vm358_vm1, %v870_v49 }
 0x20c   : > { %1215 = shalt.err (!%p1212_p9)
}
 0x20d   : > { %s1216_s29 = scalar_lea.hbm %s1689_s21, 512  ;;  %s1220_s30 = scalar_lea.hbm %s1757_s7, 2048 }
 0x20e   : > { %p1217_p10 = scmp.ne.s32.totalorder %s1689_s21, %s1216_s29  ;;  %p1221_p13 = scmp.lt.s32.totalorder %s1689_s21, %s1757_s7 }
 0x20f   : > { %p1222_p0 = scmp.lt.s32.totalorder %s1220_s30, %s1216_s29 }
 0x210   : > { %p1218_p11 = pnand %p1217_p10, %p1394_p3 }
 0x211   : > { %p1223_p1 = por %p1222_p0, %p1221_p13 }
 0x212   : > { %p1219_p12 = pneg %p1218_p11 }
 0x214   : > { %p1224_p2 = pnand %p1223_p1, %p1219_p12 }
 0x216   : > { %1227 = shalt.err (!%p1224_p2)
}
 0x217   : > { %s1301_s27 = smov 128   ;;  %s1302_s28 = smov 8  }
 0x218   : > { %1110 = dma.vmem_to_hbm [thread:$0]  (%p1394_p3), %s1691_s13, 512, %s1689_s21, %s1699_s17, %s1301_s27, %s1301_s27, %s1302_s28  }
 0x219 PF: > { %p1116_p4 = scmp.ge.s32.totalorder %s1294_s8, 2  ;;  %s916_s16 = sand.u32 1, %s1266_s24  }
 0x21a   : > { %s917_s18 = scalar_lea.sflag [#allocation4], %s916_s16 }
 0x21b   : > { %p1113_p5 = pnand %p1116_p4, %p1403_p8 }
 0x21d   : > { %p1114_p6 = pneg %p1113_p5 }
 0x21f   : > { %1261 = dma.done.wait (%p1114_p6), %s917_s18, 512  }
 0x220   : > { %1263 = vsyncadd (%p1114_p6), %s917_s18, 4294966784  ;;  %s20_s8 = sadd.s32 1, %s1294_s8   ;;  %s1782_s27 = sld [smem:[#allocation6_spill]] }
 0x221   : > { %p17_p7 = scmp.ge.s32.totalorder %s20_s8, 6   ;;  %s1783_s28 = sld [smem:[#allocation7_spill]] }
 0x222   : > { %s1784_s29 = sld [smem:[#allocation8_spill]]  ;;  %s1786_s24 = smov %s1270_s25 }
 0x223   : > { %s1785_s30 = sld [smem:[#allocation9_spill]]  ;;  %s1787_s25 = smov %s1274_s26 }
 0x224   : > { %s1788_s26 = smov %s1412_s19  ;;  %19 = sbr.rel (!%p17_p7) target bundleno = 5 (0x5), region = 92 }
 0x229   :  { %922 = vsyncpa [#allocation4], 1 }
 0x22a   :  { %924 = vsyncpa [#allocation4 + $0x1], 1 }

</bundles_post_ra>
